<compile_context>
chip_gen: v7x
topology: tpu7x:2x2x1
jax: 0.10.0
libtpu: 0.0.40
codegen_flags: <defaults>
</compile_context>

<pallas_src>
import jax
import jax.numpy as jnp
from jax.experimental import pallas as pl
from jax.experimental.pallas import tpu as pltpu


def _round_up(x, m):
    return ((x + m - 1) // m) * m


def autoencoder_kernel(x_ref,
                       w1_ref, b1_ref,
                       w2_ref, b2_ref,
                       w3_ref, b3_ref,
                       w4_ref, b4_ref,
                       o_ref):
    """Forward pass (4 matmuls + 3 ReLUs) for one lane-packed batch tile.

    All refs are in the packed representation (``pack`` consecutive batch rows
    concatenated along lanes, weights block-diagonal, biases tiled), so the
    math below is exactly the unpacked x @ W + b chain.  Matmul operands use
    the (pre-cast) weight dtype (bf16 or f32); accumulation is always f32.
    """
    mdt = w1_ref.dtype
    x = x_ref[...].astype(mdt)

    # encoder
    h = jnp.dot(x, w1_ref[...], preferred_element_type=jnp.float32) + b1_ref[...]
    h = jnp.maximum(h, 0.0).astype(mdt)
    h = jnp.dot(h, w2_ref[...], preferred_element_type=jnp.float32) + b2_ref[...]
    h = jnp.maximum(h, 0.0).astype(mdt)

    # decoder
    h = jnp.dot(h, w3_ref[...], preferred_element_type=jnp.float32) + b3_ref[...]
    h = jnp.maximum(h, 0.0).astype(mdt)
    out = jnp.dot(h, w4_ref[...], preferred_element_type=jnp.float32) + b4_ref[...]

    o_ref[...] = out.astype(o_ref.dtype)


def prepare_params(params, input_dim, *, use_bf16=True):
    """One-time parameter preparation (hoisted out of the forward pass).

    Chooses the lane-packing factor, block-diagonalizes weights / tiles biases
    so packed rows stay independent, zero-pads the feature axis for awkward
    input_dim, and (optionally) casts the matmul weights to bf16.
    """
    D = input_dim
    if D % 128 == 0:
        pack, d_pad = 1, D
    elif 128 % D == 0:
        pack, d_pad = 128 // D, D
    else:
        # Neither divides: zero-pad the feature axis to a full lane multiple so
        # loads/stores are unmasked; the padded rows/cols contribute nothing.
        pack, d_pad = 1, _round_up(D, 128)

    w1, b1 = params["w1"], params["b1"]
    w2, b2 = params["w2"], params["b2"]
    w3, b3 = params["w3"], params["b3"]
    w4, b4 = params["w4"], params["b4"]

    if d_pad != D:
        w1 = jnp.pad(w1, ((0, d_pad - D), (0, 0)))
        w4 = jnp.pad(w4, ((0, 0), (0, d_pad - D)))
        b4 = jnp.pad(b4, ((0, 0), (0, d_pad - D)))

    def bd(w):   # block-diagonal: [in, out] -> [pack*in, pack*out]
        if pack == 1:
            return w
        return jnp.kron(jnp.eye(pack, dtype=w.dtype), w)

    def tb(b):   # tile bias: [1, out] -> [1, pack*out]
        if pack == 1:
            return b
        return jnp.tile(b, (1, pack))

    mdt = jnp.bfloat16 if use_bf16 else jnp.float32
    weights = tuple(bd(w).astype(mdt) for w in (w1, w2, w3, w4))
    biases = tuple(tb(b).astype(jnp.float32) for b in (b1, b2, b3, b4))

    return {"w": weights, "b": biases,
            "pack": pack, "D": D, "d_pad": d_pad, "lane": pack * d_pad}


_VMEM_LIMIT_BYTES = 48 << 20   # below v7x's 64 MiB physical; ample on v5e/v6e
_VMEM_DATA_BUDGET = 28 << 20   # per-step budget: in/out double buffers + intermediates


def autoencoder_forward(x, prepared, *, batch_tile=8192):
    """x: [B, input_dim] float32. prepared: output of prepare_params()."""
    B, D = x.shape
    assert D == prepared["D"], "prepared params built for a different input_dim"
    pack, d_pad, lane = prepared["pack"], prepared["d_pad"], prepared["lane"]
    out_dtype = x.dtype

    if d_pad != D:
        x = jnp.pad(x, ((0, 0), (0, d_pad - D)))        # lane-dense feature pad

    # Pad only to the 8*pack row quantum (at most row_quantum-1 extra rows);
    # the grid handles the ragged last tile via pl.cdiv + masked stores.
    row_quantum = 8 * pack
    Bq = _round_up(B, row_quantum)
    if Bq != B:
        x = jnp.pad(x, ((0, Bq - B), (0, 0)))
    xp = x.reshape(Bq // pack, lane)                     # free row-major lane packing

    # --- tile selection (in unpacked rows) --------------------------------
    # Conservative per-row working-set estimate: f32 in/out double buffers,
    # f32 intermediates (32 + 16 + 32 + d_pad), plus bf16 operand copies.
    itm = 32 + 16 + 32 + d_pad
    per_row_bytes = 4 * d_pad * 2 + 4 * d_pad * 2 + 4 * itm + 2 * (d_pad + 80)
    max_rows_vmem = max(
        row_quantum,
        (_VMEM_DATA_BUDGET // per_row_bytes) // row_quantum * row_quantum)
    tile = min(_round_up(batch_tile, row_quantum), max_rows_vmem, Bq)
    tile = max(tile, row_quantum)
    # Megacore: large batches should produce >= 2 grid steps so
    # dimension_semantics=("parallel",) can shard them across TensorCores.
    if tile >= Bq and Bq >= 2048:
        tile = max(row_quantum, _round_up(pl.cdiv(Bq, 2), row_quantum))

    rows = tile // pack                                  # packed rows per grid step
    grid = (pl.cdiv(Bq // pack, rows),)

    w1, w2, w3, w4 = prepared["w"]
    b1, b2, b3, b4 = prepared["b"]

    def resident(p):
        # Tiny parameters: constant index_map keeps them resident in VMEM
        # across the whole grid (single fetch).
        return pl.BlockSpec(p.shape, lambda i: (0, 0))

    out_p = pl.pallas_call(
        autoencoder_kernel,
        out_shape=jax.ShapeDtypeStruct((Bq // pack, lane), out_dtype),
        grid_spec=pltpu.PrefetchScalarGridSpec(
            num_scalar_prefetch=0,
            grid=grid,
            in_specs=[
                pl.BlockSpec((rows, lane), lambda i: (i, 0)),   # x tile
                resident(w1), resident(b1),
                resident(w2), resident(b2),
                resident(w3), resident(b3),
                resident(w4), resident(b4),
            ],
            out_specs=pl.BlockSpec((rows, lane), lambda i: (i, 0)),
        ),
        compiler_params=pltpu.CompilerParams(
            dimension_semantics=("parallel",),
            vmem_limit_bytes=_VMEM_LIMIT_BYTES,
        ),
    )(xp, w1, b1, w2, b2, w3, b3, w4, b4)

    out = out_p.reshape(Bq, d_pad)
    if Bq != B:
        out = out[:B]
    if d_pad != D:
        out = out[:, :D]
    return out


def init_params(key, input_dim):
    """Deterministic synthetic parameters with the shapes nn.Linear implies.

    PyTorch stores Linear weights as [out, in]; we store the transpose
    [in, out] so the kernel computes x @ W + b directly.
    """
    ks = jax.random.split(key, 8)

    def lin(kw, kb, fan_in, fan_out):
        bound = 1.0 / jnp.sqrt(fan_in)
        w = jax.random.uniform(kw, (fan_in, fan_out), jnp.float32, -bound, bound)
        b = jax.random.uniform(kb, (1, fan_out), jnp.float32, -bound, bound)
        return w, b

    w1, b1 = lin(ks[0], ks[1], input_dim, 32)
    w2, b2 = lin(ks[2], ks[3], 32, 16)
    w3, b3 = lin(ks[4], ks[5], 16, 32)
    w4, b4 = lin(ks[6], ks[7], 32, input_dim)
    return dict(w1=w1, b1=b1, w2=w2, b2=b2, w3=w3, b3=b3, w4=w4, b4=b4)


def reference_forward(x, p):
    """Pure-JAX reference matching the PyTorch forward."""
    h = jnp.maximum(x @ p["w1"] + p["b1"], 0.0)
    h = jnp.maximum(h @ p["w2"] + p["b2"], 0.0)
    h = jnp.maximum(h @ p["w3"] + p["b3"], 0.0)
    return h @ p["w4"] + p["b4"]


if __name__ == "__main__":
    key = jax.random.PRNGKey(0)
    k_params, k_params2, k_x = jax.random.split(key, 3)

    # --- D=64: lane-packing path (pack=2) ---------------------------------
    input_dim = 64
    params = init_params(k_params, input_dim)
    prep_f32 = prepare_params(params, input_dim, use_bf16=False)
    prep_bf16 = prepare_params(params, input_dim, use_bf16=True)

    batch = 512
    x = jax.random.normal(k_x, (batch, input_dim), jnp.float32)
    ref = reference_forward(x, params)

    # Full-f32 math, multi-step grid (tight tolerance).
    out_f32 = jax.block_until_ready(autoencoder_forward(x, prep_f32, batch_tile=128))
    assert out_f32.shape == (batch, input_dim)
    assert jnp.allclose(out_f32, ref, atol=1e-5, rtol=1e-5)

    # bf16 matmul operands / f32 accumulation (default, perf path).
    out_bf16 = jax.block_until_ready(autoencoder_forward(x, prep_bf16))
    assert out_bf16.shape == (batch, input_dim)
    assert jnp.allclose(out_bf16, ref, atol=5e-2, rtol=5e-2)

    # --- ragged batch: pads only to the 16-row quantum --------------------
    x_small = jax.random.normal(k_x, (10, input_dim), jnp.float32)
    out_small = jax.block_until_ready(autoencoder_forward(x_small, prep_f32))
    assert out_small.shape == (10, input_dim)
    assert jnp.allclose(out_small, reference_forward(x_small, params),
                        atol=1e-5, rtol=1e-5)

    # --- awkward D=48: feature axis zero-padded to 128 lanes --------------
    input_dim2 = 48
    params2 = init_params(k_params2, input_dim2)
    prep2 = prepare_params(params2, input_dim2, use_bf16=False)
    x2 = jax.random.normal(k_x, (24, input_dim2), jnp.float32)
    out2 = jax.block_until_ready(autoencoder_forward(x2, prep2))
    assert out2.shape == (24, input_dim2)
    assert jnp.allclose(out2, reference_forward(x2, params2), atol=1e-5, rtol=1e-5)

    print("KERNEL_OK")
</pallas_src>

<mosaic_0001>
module attributes {stable_mosaic.version = 11 : i64} {
  func.func @autoencoder_kernel(%arg0: i32, %arg1: memref<64x128xf32, #tpu.memory_space<vmem>>, %arg2: memref<128x64xf32, #tpu.memory_space<vmem>>, %arg3: memref<1x64xf32, #tpu.memory_space<vmem>>, %arg4: memref<64x32xf32, #tpu.memory_space<vmem>>, %arg5: memref<1x32xf32, #tpu.memory_space<vmem>>, %arg6: memref<32x64xf32, #tpu.memory_space<vmem>>, %arg7: memref<1x64xf32, #tpu.memory_space<vmem>>, %arg8: memref<64x128xf32, #tpu.memory_space<vmem>>, %arg9: memref<1x128xf32, #tpu.memory_space<vmem>>, %arg10: memref<64x128xf32, #tpu.memory_space<vmem>>) attributes {dimension_semantics = [#tpu.dimension_semantics<parallel>], iteration_bounds = array<i64: 4>, scalar_prefetch = 0 : i64, scratch_operands = 0 : i64, tpu.core_type = #tpu.core_type<tc>, window_params = [{transform_indices = @transform_0, window_bounds = array<i64: 64, 128>}, {pipeline_mode = #tpu.pipeline_mode<synchronous>, transform_indices = @transform_1, window_bounds = array<i64: 128, 64>}, {pipeline_mode = #tpu.pipeline_mode<synchronous>, transform_indices = @transform_2, window_bounds = array<i64: 1, 64>}, {pipeline_mode = #tpu.pipeline_mode<synchronous>, transform_indices = @transform_3, window_bounds = array<i64: 64, 32>}, {pipeline_mode = #tpu.pipeline_mode<synchronous>, transform_indices = @transform_4, window_bounds = array<i64: 1, 32>}, {pipeline_mode = #tpu.pipeline_mode<synchronous>, transform_indices = @transform_5, window_bounds = array<i64: 32, 64>}, {pipeline_mode = #tpu.pipeline_mode<synchronous>, transform_indices = @transform_6, window_bounds = array<i64: 1, 64>}, {pipeline_mode = #tpu.pipeline_mode<synchronous>, transform_indices = @transform_7, window_bounds = array<i64: 64, 128>}, {pipeline_mode = #tpu.pipeline_mode<synchronous>, transform_indices = @transform_8, window_bounds = array<i64: 1, 128>}, {transform_indices = @transform_9, window_bounds = array<i64: 64, 128>}]} {
    %c0 = arith.constant 0 : index
    %c0_0 = arith.constant 0 : index
    %0 = vector.load %arg1[%c0, %c0_0] : memref<64x128xf32, #tpu.memory_space<vmem>>, vector<64x128xf32>
    %c0_1 = arith.constant 0 : index
    %c0_2 = arith.constant 0 : index
    %1 = vector.load %arg2[%c0_1, %c0_2] : memref<128x64xf32, #tpu.memory_space<vmem>>, vector<128x64xf32>
    %cst = arith.constant dense<0.000000e+00> : vector<64x64xf32>
    %2 = tpu.matmul %0, %1, %cst {dimension_numbers = #tpu.dot_dimension_numbers<[1], [0], [0], [1], [0, 0, 1, 1], [], []>} : vector<64x128xf32>, vector<128x64xf32>, vector<64x64xf32> -> vector<64x64xf32>
    %c0_3 = arith.constant 0 : index
    %c0_4 = arith.constant 0 : index
    %3 = vector.load %arg3[%c0_3, %c0_4] : memref<1x64xf32, #tpu.memory_space<vmem>>, vector<1x64xf32>
    %4 = vector.broadcast %3 : vector<1x64xf32> to vector<64x64xf32>
    %5 = arith.addf %2, %4 : vector<64x64xf32>
    %cst_5 = arith.constant 0.000000e+00 : f32
    %6 = vector.broadcast %cst_5 : f32 to vector<64x64xf32>
    %7 = arith.maximumf %5, %6 : vector<64x64xf32>
    %c0_6 = arith.constant 0 : index
    %c0_7 = arith.constant 0 : index
    %8 = vector.load %arg4[%c0_6, %c0_7] : memref<64x32xf32, #tpu.memory_space<vmem>>, vector<64x32xf32>
    %cst_8 = arith.constant dense<0.000000e+00> : vector<64x32xf32>
    %9 = tpu.matmul %7, %8, %cst_8 {dimension_numbers = #tpu.dot_dimension_numbers<[1], [0], [0], [1], [0, 0, 1, 1], [], []>} : vector<64x64xf32>, vector<64x32xf32>, vector<64x32xf32> -> vector<64x32xf32>
    %c0_9 = arith.constant 0 : index
    %c0_10 = arith.constant 0 : index
    %10 = vector.load %arg5[%c0_9, %c0_10] : memref<1x32xf32, #tpu.memory_space<vmem>>, vector<1x32xf32>
    %11 = vector.broadcast %10 : vector<1x32xf32> to vector<64x32xf32>
    %12 = arith.addf %9, %11 : vector<64x32xf32>
    %cst_11 = arith.constant 0.000000e+00 : f32
    %13 = vector.broadcast %cst_11 : f32 to vector<64x32xf32>
    %14 = arith.maximumf %12, %13 : vector<64x32xf32>
    %c0_12 = arith.constant 0 : index
    %c0_13 = arith.constant 0 : index
    %15 = vector.load %arg6[%c0_12, %c0_13] : memref<32x64xf32, #tpu.memory_space<vmem>>, vector<32x64xf32>
    %cst_14 = arith.constant dense<0.000000e+00> : vector<64x64xf32>
    %16 = tpu.matmul %14, %15, %cst_14 {dimension_numbers = #tpu.dot_dimension_numbers<[1], [0], [0], [1], [0, 0, 1, 1], [], []>} : vector<64x32xf32>, vector<32x64xf32>, vector<64x64xf32> -> vector<64x64xf32>
    %c0_15 = arith.constant 0 : index
    %c0_16 = arith.constant 0 : index
    %17 = vector.load %arg7[%c0_15, %c0_16] : memref<1x64xf32, #tpu.memory_space<vmem>>, vector<1x64xf32>
    %18 = vector.broadcast %17 : vector<1x64xf32> to vector<64x64xf32>
    %19 = arith.addf %16, %18 : vector<64x64xf32>
    %cst_17 = arith.constant 0.000000e+00 : f32
    %20 = vector.broadcast %cst_17 : f32 to vector<64x64xf32>
    %21 = arith.maximumf %19, %20 : vector<64x64xf32>
    %c0_18 = arith.constant 0 : index
    %c0_19 = arith.constant 0 : index
    %22 = vector.load %arg8[%c0_18, %c0_19] : memref<64x128xf32, #tpu.memory_space<vmem>>, vector<64x128xf32>
    %cst_20 = arith.constant dense<0.000000e+00> : vector<64x128xf32>
    %23 = tpu.matmul %21, %22, %cst_20 {dimension_numbers = #tpu.dot_dimension_numbers<[1], [0], [0], [1], [0, 0, 1, 1], [], []>} : vector<64x64xf32>, vector<64x128xf32>, vector<64x128xf32> -> vector<64x128xf32>
    %c0_21 = arith.constant 0 : index
    %c0_22 = arith.constant 0 : index
    %24 = vector.load %arg9[%c0_21, %c0_22] : memref<1x128xf32, #tpu.memory_space<vmem>>, vector<1x128xf32>
    %25 = vector.broadcast %24 : vector<1x128xf32> to vector<64x128xf32>
    %26 = arith.addf %23, %25 : vector<64x128xf32>
    %c0_23 = arith.constant 0 : index
    %c0_24 = arith.constant 0 : index
    %27 = vector.load %arg10[%c0_23, %c0_24] : memref<64x128xf32, #tpu.memory_space<vmem>>, vector<64x128xf32>
    tpu.vector_store %arg10[%c0_23, %c0_24], %26 {strides = array<i32>} : memref<64x128xf32, #tpu.memory_space<vmem>>, vector<64x128xf32>,
    return
  }
  func.func @transform_0(%arg0: i32) -> (i32, i32) {
    %c0_i32 = arith.constant 0 : i32
    %c0_i32_0 = arith.constant 0 : i32
    return %arg0, %c0_i32 : i32, i32
  }
  func.func @transform_1(%arg0: i32) -> (i32, i32) {
    %c0_i32 = arith.constant 0 : i32
    %c0_i32_0 = arith.constant 0 : i32
    %c0_i32_1 = arith.constant 0 : i32
    return %c0_i32, %c0_i32_0 : i32, i32
  }
  func.func @transform_2(%arg0: i32) -> (i32, i32) {
    %c0_i32 = arith.constant 0 : i32
    %c0_i32_0 = arith.constant 0 : i32
    %c0_i32_1 = arith.constant 0 : i32
    return %c0_i32, %c0_i32_0 : i32, i32
  }
  func.func @transform_3(%arg0: i32) -> (i32, i32) {
    %c0_i32 = arith.constant 0 : i32
    %c0_i32_0 = arith.constant 0 : i32
    %c0_i32_1 = arith.constant 0 : i32
    return %c0_i32, %c0_i32_0 : i32, i32
  }
  func.func @transform_4(%arg0: i32) -> (i32, i32) {
    %c0_i32 = arith.constant 0 : i32
    %c0_i32_0 = arith.constant 0 : i32
    %c0_i32_1 = arith.constant 0 : i32
    return %c0_i32, %c0_i32_0 : i32, i32
  }
  func.func @transform_5(%arg0: i32) -> (i32, i32) {
    %c0_i32 = arith.constant 0 : i32
    %c0_i32_0 = arith.constant 0 : i32
    %c0_i32_1 = arith.constant 0 : i32
    return %c0_i32, %c0_i32_0 : i32, i32
  }
  func.func @transform_6(%arg0: i32) -> (i32, i32) {
    %c0_i32 = arith.constant 0 : i32
    %c0_i32_0 = arith.constant 0 : i32
    %c0_i32_1 = arith.constant 0 : i32
    return %c0_i32, %c0_i32_0 : i32, i32
  }
  func.func @transform_7(%arg0: i32) -> (i32, i32) {
    %c0_i32 = arith.constant 0 : i32
    %c0_i32_0 = arith.constant 0 : i32
    %c0_i32_1 = arith.constant 0 : i32
    return %c0_i32, %c0_i32_0 : i32, i32
  }
  func.func @transform_8(%arg0: i32) -> (i32, i32) {
    %c0_i32 = arith.constant 0 : i32
    %c0_i32_0 = arith.constant 0 : i32
    %c0_i32_1 = arith.constant 0 : i32
    return %c0_i32, %c0_i32_0 : i32, i32
  }
  func.func @transform_9(%arg0: i32) -> (i32, i32) {
    %c0_i32 = arith.constant 0 : i32
    %c0_i32_0 = arith.constant 0 : i32
    return %arg0, %c0_i32 : i32, i32
  }
}

</mosaic_0001>

<bundles_post_ra>
// kernel: tpu_custom_call.1
= control target key start
LH: loop header
LB: loop body
LE: loop exit
PB: predicated region body
PF: predicated region fallthrough
CT: control target
= control target key end

     0   :  { %14 = vsyncpa [#allocation3], 0  ;;  %s1823_s0 = inlined_call_operand.vmem [shape: f32[256,128], index: 0, kind: input, shape index: {}]   ;;  %s1824_s1 = inlined_call_operand.vmem [shape: f32[128,64], index: 1, kind: input, shape index: {}]   ;;  %s1825_s2 = inlined_call_operand.vmem [shape: f32[1,64], index: 2, kind: input, shape index: {}]   ;;  %s1826_s3 = inlined_call_operand.vmem [shape: f32[64,32], index: 3, kind: input, shape index: {}]   ;;  %s1827_s4 = inlined_call_operand.vmem [shape: f32[1,32], index: 4, kind: input, shape index: {}]   ;;  %s1828_s5 = inlined_call_operand.vmem [shape: f32[32,64], index: 5, kind: input, shape index: {}]   ;;  %s1829_s6 = inlined_call_operand.vmem [shape: f32[1,64], index: 6, kind: input, shape index: {}]   ;;  %s1830_s7 = inlined_call_operand.hbm [shape: f32[64,128], index: 7, kind: input, shape index: {}]   ;;  %s1831_s8 = inlined_call_operand.vmem [shape: f32[1,128], index: 8, kind: input, shape index: {}]   ;;  %s1832_s9 = inlined_call_operand.hbm [shape: f32[256,128], index: 9, kind: output, shape index: {}]  }
   0x1   :  { %15 = vsyncpa [#allocation4], 0 }
   0x2   :  { %17 = vsyncpa [#allocation4 + $0x1], 0  ;;  %s1552_s30 = smov 0   ;;  %s1554_s10 = smov 0  }
   0x3   :  { %s1556_s11 = smov 0   ;;  %s1558_s12 = smov 0  }
   0x4 LB: > { %s1573_s13 = sadd.s32 4294967295, %s1494_s12   ;;  %s1035_s14 = sadd.s32 4294967294, %s1494_s12   ;;  %s1494_s12 = sphi %s1558_s12, %s1848_s12   ;;  %s1490_s11 = sphi %s1556_s11, %s1847_s11   ;;  %s1486_s10 = sphi %s1554_s10, %s1846_s10   ;;  %s1482_s30 = sphi %s1552_s30, %s1845_s30  }
   0x5   : > { %s1577_s15 = sadd.s32 1, %s1494_s12   ;;  %s224_s16 = sadd.s32 1, %s1490_s11 }
   0x6   : > { %s221_s17 = ssub.s32 %s1494_s12, %s1577_s15  ;;  %p234_p0 = scmp.ne.s32.totalorder %s1490_s11, %s1486_s10 }
   0x7   : > { %p222_p1 = scmp.eq.s32.totalorder %s221_s17, 0  ;;  %p235_p2 = scmp.eq.s32.totalorder %s1573_s13, 3 }
   0x8   : > { %p240_p3 = scmp.ne.s32.totalorder %s1486_s10, %s1482_s30  ;;  %p241_p4 = scmp.eq.s32.totalorder %s1035_s14, 3 }
   0x9   : > { %s1588_s18 = scalar_select %p222_p1, %s1490_s11, %s224_s16  }
   0xa   : > { %p1590_p5 = por %p235_p2, %p234_p0  ;;  %p1594_p6 = por %p241_p4, %p240_p3 }
   0xb   : > { %p1036_p7 = scmp.ge.s32.totalorder %s1494_s12, 1  ;;  %p248_p8 = scmp.lt.s32.totalorder %s1494_s12, 5 }
   0xc   : > { %s1836_s19 = scalar_select %p1590_p5, 1, 0 }
   0xd   : > { %s1837_s20 = scalar_select %p1594_p6, 1, 0 }
   0xe   : > { %p1833_p9 = scmp.eq.s32.totalorder %s1573_s13, 0  ;;  %p1601_p10 = pnand %p1036_p7, %p248_p8 }
   0xf   : > { %s1496_s22 = smov [#allocation2]   ;;  %s1400_s27 = scalar_lea.hbm %s1830_s7, 1024 }
  0x10   : > { %s1838_s21 = scalar_select %p1601_p10, 1, 0 }
  0x11   : > { %s278_s23 = sshll.u32 %s1496_s22, 4  ;;  %p1352_p11 = pneg %p1601_p10  ;;  %s279_s23 = int_to_ptr.vmem [resolvable:$true] %s278_s23 }
  0x12   : > { %p1401_p13 = scmp.ne.s32.totalorder %s1830_s7, %s1400_s27  ;;  %p1407_p3 = scmp.lt.u32.totalorder %s1400_s27, %s1830_s7 }
  0x13   : > { %p1609_p12 = pnand %p1833_p9, %p1352_p11 }
  0x15   : > { %p1402_p0 = pneg %p1609_p12 }
  0x17   : > { %p1403_p1 = pnand %p1402_p0, %p1401_p13 }
  0x19   : > { %p1404_p2 = pneg %p1403_p1 }
  0x1b   : > { %p1409_p4 = pnand %p1407_p3, %p1404_p2 }
  0x1d   : > { %1412 = shalt.err (!%p1409_p4)
}
  0x1e   : > { %s1413_s17 = scalar_lea.vmem %s279_s23, 1024  ;;  %p1421_p9 = scmp.lt.s32.totalorder %s279_s23, %s279_s23 }
  0x1f   : > { %p1414_p7 = scmp.ne.s32.totalorder %s279_s23, %s1413_s17  ;;  %p1422_p6 = scmp.lt.s32.totalorder %s1413_s17, %s1413_s17 }
  0x21   : > { %p1416_p8 = pnand %p1414_p7, %p1402_p0  ;;  %p1423_p5 = por %p1422_p6, %p1421_p9 }
  0x23   : > { %p1417_p11 = pneg %p1416_p8 }
  0x25   : > { %p1424_p10 = pnand %p1423_p5, %p1417_p11 }
  0x27   : > { %1427 = shalt.err (!%p1424_p10)
}
  0x28   : > { %s1497_s22 = smov 128   ;;  %s1498_s25 = smov 8  }
  0x29   : > { %1355 = dma.hbm_to_vmem [thread:$0]  (!%p1609_p12), %s1830_s7, 1024, %s279_s23, [#allocation3], %s1497_s22, %s1497_s22, %s1498_s25  }
  0x2a   : > { %p1840_p13 = scmp.ne.s32.totalorder %s1838_s21, 0 }
  0x2b   : > { %p1841_p1 = scmp.eq.s32.totalorder (!%p1840_p13), %s1573_s13, 0 }
  0x2c   : > { %306 = sbr.rel (%p1840_p13) target bundleno = 983 (0x3d7), region = 56 }
  0x33   : > { %1473 = dma.done.wait (%p1841_p1), [#allocation3], 1024   ;;  %p1842_p0 = pmov %p1841_p1 }
  0x34   : > { %s1042_s27 = sshll.u32 %s1573_s13, 3  ;;  %v357_v0 = vld [vmem:[%s1824_s1] sm:$0xff]  ;;  %v358_v1 = vld [vmem:[%s1824_s1 + $0x8] sm:$0xff]  ;;  %v359_v2 = vld [vmem:[%s1824_s1 + $0x10] sm:$0xff]  ;;  %vm508_vm0 = vcmask 523264   ;;  %vm657_vm1 = vcmask 261120  }
  0x35   : > { %1475 = vsyncadd (%p1842_p0), [#allocation3], 4294966272  ;;  %p343_p5 = scmp.lt.s32.totalorder %s1042_s27, 31  ;;  %v1266_v3 = vpack.c.bf16 %v358_v1, %v357_v0  ;;  %v360_v4 = vld [vmem:[%s1824_s1 + $0x18] sm:$0xff]  ;;  %v361_v6 = vld [vmem:[%s1824_s1 + $0x20] sm:$0xff]  ;;  %s339_s28 = sand.u32 1, %s1486_s10  }
  0x36   : > { %v1270_v5 = vpack.c.bf16 %v360_v4, %v359_v2  ;;  %v362_v7 = vld [vmem:[%s1824_s1 + $0x28] sm:$0xff]  ;;  %v363_v10 = vld [vmem:[%s1824_s1 + $0x30] sm:$0xff]  ;;  %v364_v11 = vld [vmem:[%s1824_s1 + $0x38] sm:$0xff]  ;;  %s1077_s16 = sshll.u32 %s1573_s13, 10  ;;  %s1782_s13 = scalar_lea.sflag [#allocation4], %s339_s28 }
  0x37   : > { %s1850_s27 = smov (!%p343_p5, %s1042_s27), 31  ;;  %1267 = vmatprep.subr.bf16.mxu0 %v1266_v3  ;;  %v1274_v8 = vpack.c.bf16 %v362_v7, %v361_v6  ;;  %v493_v12 = vld [vmem:[%s1826_s3] sm:$0xff]  ;;  %v494_v13 = vld [vmem:[%s1826_s3 + $0x8] sm:$0xff]  ;;  %v495_v14 = vld [vmem:[%s1826_s3 + $0x10] sm:$0xff]  ;;  %v1278_v15 = vpack.c.bf16 %v364_v11, %v363_v10  ;;  %s1778_s22 = scalar_lea.hbm %s1832_s9, %s1077_s16 }
  0x38   : > { %s1043_s29 = sshll.u32 %s1850_s27, 3  ;;  %1269 = vmatpush3.bf16.msra.mxu0 %v1266_v3  ;;  %v365_v16 = vld [vmem:[%s1824_s1 + $0x40] sm:$0xff]  ;;  %v1298_v17 = vpack.c.bf16 %v494_v13, %v493_v12  ;;  %v496_v18 = vld [vmem:[%s1826_s3 + $0x18] sm:$0xff]  ;;  %v366_v19 = vld [vmem:[%s1824_s1 + $0x48] sm:$0xff]  ;;  %p1843_p9 = scmp.ne.s32.totalorder %s1836_s19, 0 }
  0x39   : > { %s1657_s23 = scalar_lea.vmem %s1823_s0, %s1043_s29  ;;  %1271 = vmatprep.subr.bf16.mxu0 %v1270_v5  ;;  %v1302_v20 = vpack.c.bf16 %v496_v18, %v495_v14  ;;  %v497_v21 = vld [vmem:[%s1826_s3 + $0x20] sm:$0xff]  ;;  %v498_v22 = vld [vmem:[%s1826_s3 + $0x28] sm:$0xff]  ;;  %v1282_v23 = vpack.c.bf16 %v366_v19, %v365_v16  ;;  %v367_v25 = vld [vmem:[%s1824_s1 + $0x50] sm:$0xff]  ;;  %s1041_s29 = sshll.u32 %s339_s28, 6 }
  0x3a   : > { %v349_v9 = vld [vmem:[%s1657_s23] sm:$0xff]  ;;  %1299 = vmatprep.subr.bf16.mxu1 %v1298_v17  ;;  %v1306_v24 = vpack.c.bf16 %v498_v22, %v497_v21  ;;  %v368_v26 = vld [vmem:[%s1824_s1 + $0x58] sm:$0xff]  ;;  %v370_v29 = vld [vmem:[%s1824_s1 + $0x68] sm:$0xff]  ;;  %s341_s14 = scalar_lea.vmem [#allocation5], %s1041_s29  ;;  %s1499_s26 = smov [#allocation5]  }
  0x3b   : > { %1178 = vmatprep.mubr.f32.mxu0 %v349_v9  ;;  %1301 = vmatpush3.bf16.msra.mxu1 %v1298_v17  ;;  %v1286_v27 = vpack.c.bf16 %v368_v26, %v367_v25  ;;  %v369_v28 = vld [vmem:[%s1824_s1 + $0x60] sm:$0xff]  ;;  %v371_v31 = vld [vmem:[%s1824_s1 + $0x70] sm:$0xff]  ;;  %v372_v32 = vld [vmem:[%s1824_s1 + $0x78] sm:$0xff]  ;;  %s961_s24 = sshll.u32 %s341_s14, 4  ;;  %s1432_s29 = sshll.u32 %s1499_s26, 4  ;;  %s1773_s24 = int_to_ptr.vmem [resolvable:$true] %s961_s24  ;;  %s1433_s29 = int_to_ptr.vmem [resolvable:$false] %s1432_s29 }
  0x3c   : > { %1273 = vmatpush3.bf16.msra.mxu0 %v1270_v5  ;;  %1303 = vmatprep.subr.bf16.mxu1 %v1302_v20  ;;  %v1290_v30 = vpack.c.bf16 %v370_v29, %v369_v28  ;;  %v1294_v33 = vpack.c.bf16 %v372_v32, %v371_v31  ;;  %v350_v34 = vld [vmem:[%s1657_s23 + $0x8] sm:$0xff]  ;;  %v351_v35 = vld [vmem:[%s1657_s23 + $0x10] sm:$0xff]  ;;  %v352_v36 = vld [vmem:[%s1657_s23 + $0x18] sm:$0xff]  ;;  %s1428_s25 = scalar_lea.vmem %s1773_s24, 1024  ;;  %p1435_p2 = scmp.lt.s32.totalorder %s1773_s24, %s1433_s29 }
  0x3d   : > { %1275 = vmatprep.subr.bf16.mxu0 %v1274_v8  ;;  %v353_v37 = vld [vmem:[%s1657_s23 + $0x20] sm:$0xff]  ;;  %v354_v38 = vld [vmem:[%s1657_s23 + $0x28] sm:$0xff]  ;;  %v355_v39 = vld [vmem:[%s1657_s23 + $0x30] sm:$0xff]  ;;  %p1429_p6 = scmp.ne.s32.totalorder %s1773_s24, %s1428_s25 }
  0x3e   : > { %v356_v40 = vld [vmem:[%s1657_s23 + $0x38] sm:$0xff]  ;;  %v499_v41 = vld [vmem:[%s1826_s3 + $0x30] sm:$0xff]  ;;  %v646_v44 = vld [vmem:[%s1828_s5] sm:$0xff]  ;;  %s1434_s23 = scalar_lea.vmem %s1433_s29, 2048 }
  0x3f   : > { %1305 = vmatpush3.bf16.msra.mxu1 %v1302_v20  ;;  %v500_v42 = vld [vmem:[%s1826_s3 + $0x38] sm:$0xff]  ;;  %v647_v45 = vld [vmem:[%s1828_s5 + $0x8] sm:$0xff]  ;;  %v1044_v47 = vld [vmem:[%s1825_s2] ss:$0 sm:$0xff]  ;;  %p1430_p10 = pnand %p1429_p6, %p1843_p9  ;;  %p1436_p3 = scmp.lt.s32.totalorder %s1434_s23, %s1428_s25 }
  0x40   : > { %1277 = vmatpush3.bf16.msra.mxu0 %v1274_v8  ;;  %1307 = vmatprep.subr.bf16.mxu1 %v1306_v24  ;;  %v1310_v43 = vpack.c.bf16 %v500_v42, %v499_v41  ;;  %v1314_v46 = vpack.c.bf16 %v647_v45, %v646_v44  ;;  %v648_v52 = vld [vmem:[%s1828_s5 + $0x10] sm:$0xff]  ;;  %v649_v53 = vld [vmem:[%s1828_s5 + $0x18] sm:$0xff]  ;;  %v795_v11 = vld [vmem:[#allocation2] sm:$0xff] }
  0x41   : > { %1279 = vmatprep.subr.bf16.mxu0 %v1278_v15  ;;  %v1318_v59 = vpack.c.bf16 %v649_v53, %v648_v52  ;;  %v796_v12 = vld [vmem:[#allocation2 + $0x8] sm:$0xff]  ;;  %v797_v13 = vld [vmem:[#allocation2 + $0x10] sm:$0xff]  ;;  %v799_v17 = vld [vmem:[#allocation2 + $0x20] sm:$0xff]  ;;  %p1431_p12 = pneg %p1430_p10  ;;  %p1437_p4 = por %p1436_p3, %p1435_p2 }
  0x42   : > { %v1322_v14 = vpack.c.bf16 %v796_v12, %v795_v11  ;;  %v800_v18 = vld [vmem:[#allocation2 + $0x28] sm:$0xff]  ;;  %v1045_v20 = vld [vmem:[%s1827_s4] ss:$0 sm:$0xff]  ;;  %v801_v45 = vld [vmem:[#allocation2 + $0x30] sm:$0xff] }
  0x43   : > { %1309 = vmatpush3.bf16.msra.mxu1 %v1306_v24  ;;  %v1330_v19 = vpack.c.bf16 %v800_v18, %v799_v17  ;;  %p1438_p7 = pnand %p1437_p4, %p1431_p12 }
  0x44   : > { %1281 = vmatpush3.bf16.msra.mxu0 %v1278_v15  ;;  %1311 = vmatprep.subr.bf16.mxu1 %v1310_v43  ;;  %v798_v15 = vld [vmem:[#allocation2 + $0x18] sm:$0xff] }
  0x45   : > { %1283 = vmatprep.subr.bf16.mxu0 %v1282_v23  ;;  %v1326_v16 = vpack.c.bf16 %v798_v15, %v797_v13 }
  0x47   : > { %1313 = vmatpush3.bf16.msra.mxu1 %v1310_v43 }
  0x48   : > { %1285 = vmatpush3.bf16.msra.mxu0 %v1282_v23  ;;  %1315 = vmatprep.subr.bf16.mxu1 %v1314_v46 }
  0x49   : > { %1287 = vmatprep.subr.bf16.mxu0 %v1286_v27 }
  0x4c   : > { %1289 = vmatpush3.bf16.msra.mxu0 %v1286_v27 }
  0x4d   : > { %1291 = vmatprep.subr.bf16.mxu0 %v1290_v30 }
  0x50   : > { %1293 = vmatpush3.bf16.msra.mxu0 %v1290_v30 }
  0x51   : > { %1295 = vmatprep.subr.bf16.mxu0 %v1294_v33 }
  0x54   : > { %1297 = vmatpush3.bf16.msra.mxu0 %v1294_v33 }
  0x55   : > { %1323 = vmatprep.subr.bf16.mxu0 %v1322_v14 }
  0x57   : > { %1179 = vmatmul.mubr.f32.vlgmr.msra.gmra.mrb[0].mxu0 %v350_v34 }
  0x58   : > { %1181 = vmatprep.mubr.f32.mxu0 %v351_v35  ;;  %1325 = vmatpush3.bf16.msra.mxu0 %v1322_v14 }
  0x59   : > { %1327 = vmatprep.subr.bf16.mxu0 %v1326_v16 }
  0x5b   : > { %1182 = vmatmul.mubr.f32.gmra.mrb[2].mxu0 %v352_v36 }
  0x5c   : > { %1184 = vmatprep.mubr.f32.mxu0 %v353_v37  ;;  %1329 = vmatpush3.bf16.msra.mxu0 %v1326_v16 }
  0x5d   : > { %1331 = vmatprep.subr.bf16.mxu0 %v1330_v19 }
  0x5f   : > { %1185 = vmatmul.mubr.f32.gmra.mrb[4].mxu0 %v354_v38 }
  0x60   : > { %1187 = vmatprep.mubr.f32.mxu0 %v355_v39  ;;  %1333 = vmatpush3.bf16.msra.mxu0 %v1330_v19 }
  0x63   : > { %1188 = vmatmul.mubr.f32.gmra.mrb[6].mxu0 %v356_v40 }
 0x12a   : > { %v1180_v48 = vpop.f32.mrb[0].mxu0 }
 0x12b   : > { %v452_v49 = vadd.f32 %v1180_v48, %v1044_v47  ;;  %v446_v50 = vpop.f32.mrb[1].mxu0  ;;  %v1054_v48 = vld [vmem:[%s1829_s6] ss:$0 sm:$0xff] }
 0x12c   : > { %v447_v51 = vadd.f32 %v1044_v47, %v446_v50 }
 0x12d   : > { %v486_v56 = vmax.f32 %v452_v49, 0.0 }
 0x12e   : > { %v485_v54 = vmax.f32 %v447_v51, 0.0  ;;  %v1183_v55 = vpop.f32.mrb[2].mxu0 }
 0x12f   : > { %v462_v57 = vadd.f32 %v1183_v55, %v1044_v47  ;;  %v456_v58 = vpop.f32.mrb[3].mxu0 }
 0x130   : > { %v457_v60 = vadd.f32 %v1044_v47, %v456_v58  ;;  %1206 = vmatprep.mubr.msk.f32.mxu1 %vm508_vm0, %v485_v54 }
 0x131   : > { %1207 = vmatmul.mubr.msk.f32.vlgmr.msra.gmra.mrb[0].mxu1 %vm508_vm0, %v486_v56  ;;  %v488_v63 = vmax.f32 %v462_v57, 0.0 }
 0x132   : > { %v487_v61 = vmax.f32 %v457_v60, 0.0  ;;  %v1186_v62 = vpop.f32.mrb[4].mxu0  ;;  %1317 = vmatpush3.bf16.msra.mxu1 %v1314_v46  ;;  %v802_v46 = vld [vmem:[#allocation2 + $0x38] sm:$0xff] }
 0x133   : > { %v472_v0 = vadd.f32 %v1186_v62, %v1044_v47  ;;  %v466_v1 = vpop.f32.mrb[5].mxu0  ;;  %1319 = vmatprep.subr.bf16.mxu1 %v1318_v59 }
 0x134   : > { %v467_v2 = vadd.f32 %v1044_v47, %v466_v1  ;;  %1209 = vmatprep.mubr.msk.f32.mxu1 %vm508_vm0, %v487_v61 }
 0x135   : > { %1210 = vmatmul.mubr.msk.f32.gmra.mrb[2].mxu1 %vm508_vm0, %v488_v63  ;;  %v490_v5 = vmax.f32 %v472_v0, 0.0 }
 0x136   : > { %v489_v3 = vmax.f32 %v467_v2, 0.0  ;;  %v1189_v4 = vpop.f32.mrb[6].mxu0  ;;  %1321 = vmatpush3.bf16.msra.mxu1 %v1318_v59 }
 0x137   : > { %v482_v6 = vadd.f32 %v1189_v4, %v1044_v47  ;;  %v476_v7 = vpop.f32.mrb[7].mxu0  ;;  %1338 = vmatprep.subr.bf16.mxu1 %v1322_v14 }
 0x138   : > { %v477_v8 = vadd.f32 %v1044_v47, %v476_v7  ;;  %1212 = vmatprep.mubr.msk.f32.mxu1 %vm508_vm0, %v489_v3  ;;  %v1334_v47 = vpack.c.bf16 %v802_v46, %v801_v45 }
 0x139   : > { %1213 = vmatmul.mubr.msk.f32.gmra.mrb[4].mxu1 %vm508_vm0, %v490_v5  ;;  %v492_v10 = vmax.f32 %v482_v6, 0.0 }
 0x13a   : > { %v491_v9 = vmax.f32 %v477_v8, 0.0  ;;  %1335 = vmatprep.subr.bf16.mxu0 %v1334_v47 }
 0x13b   : > { %1337 = vmatpush3.bf16.msra.mxu0 %v1334_v47 }
 0x13c   : > { %1215 = vmatprep.mubr.msk.f32.mxu1 %vm508_vm0, %v491_v9  ;;  %v1063_v9 = vld [vmem:[%s1831_s8] ss:$0 sm:$0xff] }
 0x13d   : > { %1216 = vmatmul.mubr.msk.f32.gmra.mrb[6].mxu1 %vm508_vm0, %v492_v10 }
 0x204   : > { %v1208_v21 = vpop.f32.mrb[0].mxu1 }
 0x205   : > { %v605_v22 = vadd.f32 %v1208_v21, %v1045_v20  ;;  %v599_v23 = vpop.f32.mrb[1].mxu1 }
 0x206   : > { %v600_v24 = vadd.f32 %v1045_v20, %v599_v23 }
 0x207   : > { %v639_v27 = vmax.f32 %v605_v22, 0.0 }
 0x208   : > { %v638_v25 = vmax.f32 %v600_v24, 0.0  ;;  %v1211_v26 = vpop.f32.mrb[2].mxu1 }
 0x209   : > { %v615_v28 = vadd.f32 %v1211_v26, %v1045_v20  ;;  %v609_v29 = vpop.f32.mrb[3].mxu1 }
 0x20a   : > { %v610_v30 = vadd.f32 %v1045_v20, %v609_v29  ;;  %1226 = vmatprep.mubr.msk.f32.mxu1 %vm657_vm1, %v638_v25 }
 0x20b   : > { %1227 = vmatmul.mubr.msk.f32.vlgmr.msra.gmra.mrb[8].mxu1 %vm657_vm1, %v639_v27  ;;  %v641_v33 = vmax.f32 %v615_v28, 0.0 }
 0x20c   : > { %v640_v31 = vmax.f32 %v610_v30, 0.0  ;;  %v1214_v32 = vpop.f32.mrb[4].mxu1  ;;  %1342 = vmatpush3.bf16.msra.mxu1 %v1322_v14 }
 0x20d   : > { %v625_v34 = vadd.f32 %v1214_v32, %v1045_v20  ;;  %v619_v35 = vpop.f32.mrb[5].mxu1  ;;  %1339 = vmatprep.subr.bf16.mxu1 %v1326_v16 }
 0x20e   : > { %v620_v36 = vadd.f32 %v1045_v20, %v619_v35  ;;  %1229 = vmatprep.mubr.msk.f32.mxu1 %vm657_vm1, %v640_v31 }
 0x20f   : > { %1230 = vmatmul.mubr.msk.f32.gmra.mrb[10].mxu1 %vm657_vm1, %v641_v33  ;;  %v643_v39 = vmax.f32 %v625_v34, 0.0 }
 0x210   : > { %v642_v37 = vmax.f32 %v620_v36, 0.0  ;;  %v1217_v38 = vpop.f32.mrb[6].mxu1  ;;  %1343 = vmatpush3.bf16.msra.mxu1 %v1326_v16 }
 0x211   : > { %v635_v40 = vadd.f32 %v1217_v38, %v1045_v20  ;;  %v629_v41 = vpop.f32.mrb[7].mxu1  ;;  %1340 = vmatprep.subr.bf16.mxu1 %v1330_v19 }
 0x212   : > { %v630_v42 = vadd.f32 %v1045_v20, %v629_v41  ;;  %1232 = vmatprep.mubr.msk.f32.mxu1 %vm657_vm1, %v642_v37 }
 0x213   : > { %1233 = vmatmul.mubr.msk.f32.gmra.mrb[12].mxu1 %vm657_vm1, %v643_v39  ;;  %v645_v44 = vmax.f32 %v635_v40, 0.0 }
 0x214   : > { %v644_v43 = vmax.f32 %v630_v42, 0.0  ;;  %1344 = vmatpush3.bf16.msra.mxu1 %v1330_v19 }
 0x215   : > { %1341 = vmatprep.subr.bf16.mxu1 %v1334_v47 }
 0x216   : > { %1235 = vmatprep.mubr.msk.f32.mxu1 %vm657_vm1, %v644_v43 }
 0x217   : > { %1236 = vmatmul.mubr.msk.f32.gmra.mrb[14].mxu1 %vm657_vm1, %v645_v44 }
 0x218   : > { %1345 = vmatpush3.bf16.msra.mxu1 %v1334_v47 }
 0x2de   : > { %v1228_v49 = vpop.f32.mrb[8].mxu1 }
 0x2df   : > { %v754_v50 = vadd.f32 %v1228_v49, %v1054_v48  ;;  %v748_v51 = vpop.f32.mrb[9].mxu1 }
 0x2e0   : > { %v749_v52 = vadd.f32 %v1054_v48, %v748_v51 }
 0x2e1   : > { %v788_v55 = vmax.f32 %v754_v50, 0.0 }
 0x2e2   : > { %v787_v53 = vmax.f32 %v749_v52, 0.0  ;;  %v1231_v54 = vpop.f32.mrb[10].mxu1 }
 0x2e3   : > { %v764_v56 = vadd.f32 %v1231_v54, %v1054_v48  ;;  %v758_v57 = vpop.f32.mrb[11].mxu1 }
 0x2e4   : > { %v759_v58 = vadd.f32 %v1054_v48, %v758_v57  ;;  %1254 = vmatprep.mubr.msk.f32.mxu0 %vm508_vm0, %v787_v53 }
 0x2e5   : > { %1255 = vmatmul.mubr.msk.f32.vlgmr.msra.gmra.mrb[8].mxu0 %vm508_vm0, %v788_v55  ;;  %v790_v61 = vmax.f32 %v764_v56, 0.0 }
 0x2e6   : > { %v789_v59 = vmax.f32 %v759_v58, 0.0  ;;  %v1234_v60 = vpop.f32.mrb[12].mxu1 }
 0x2e7   : > { %v774_v62 = vadd.f32 %v1234_v60, %v1054_v48  ;;  %v768_v63 = vpop.f32.mrb[13].mxu1 }
 0x2e8   : > { %v769_v0 = vadd.f32 %v1054_v48, %v768_v63  ;;  %1257 = vmatprep.mubr.msk.f32.mxu0 %vm508_vm0, %v789_v59 }
 0x2e9   : > { %1258 = vmatmul.mubr.msk.f32.gmra.mrb[10].mxu0 %vm508_vm0, %v790_v61  ;;  %v792_v3 = vmax.f32 %v774_v62, 0.0 }
 0x2ea   : > { %v791_v1 = vmax.f32 %v769_v0, 0.0  ;;  %v1237_v2 = vpop.f32.mrb[14].mxu1 }
 0x2eb   : > { %v784_v4 = vadd.f32 %v1237_v2, %v1054_v48  ;;  %v778_v5 = vpop.f32.mrb[15].mxu1 }
 0x2ec   : > { %v779_v6 = vadd.f32 %v1054_v48, %v778_v5  ;;  %1260 = vmatprep.mubr.msk.f32.mxu1 %vm508_vm0, %v791_v1 }
 0x2ed   : > { %1261 = vmatmul.mubr.msk.f32.vlgmr.msra.gmra.mrb[16].mxu1 %vm508_vm0, %v792_v3  ;;  %v794_v8 = vmax.f32 %v784_v4, 0.0 }
 0x2ee   : > { %v793_v7 = vmax.f32 %v779_v6, 0.0 }
 0x2f0   : > { %1263 = vmatprep.mubr.msk.f32.mxu1 %vm508_vm0, %v793_v7 }
 0x2f1   : > { %1264 = vmatmul.mubr.msk.f32.gmra.mrb[18].mxu1 %vm508_vm0, %v794_v8 }
 0x3b8   : > { %v1256_v10 = vpop.f32.mrb[8].mxu0 }
 0x3b9   : > { %v906_v11 = vadd.f32 %v1256_v10, %v1063_v9  ;;  %v900_v12 = vpop.f32.mrb[9].mxu0 }
 0x3ba   : > { %v901_v13 = vadd.f32 %v1063_v9, %v900_v12 }
 0x3bb   : > { %940 = vst [vmem:[%s341_s14 + $0x8] sm:$0xff] %v906_v11 }
 0x3bc   : > { %939 = vst [vmem:[%s341_s14] sm:$0xff] %v901_v13  ;;  %v1259_v14 = vpop.f32.mrb[10].mxu0 }
 0x3bd   : > { %v916_v15 = vadd.f32 %v1259_v14, %v1063_v9  ;;  %v910_v16 = vpop.f32.mrb[11].mxu0 }
 0x3be   : > { %v911_v17 = vadd.f32 %v1063_v9, %v910_v16 }
 0x3bf   : > { %942 = vst [vmem:[%s341_s14 + $0x18] sm:$0xff] %v916_v15 }
 0x3c0   : > { %941 = vst [vmem:[%s341_s14 + $0x10] sm:$0xff] %v911_v17  ;;  %v1262_v18 = vpop.f32.mrb[16].mxu1 }
 0x3c1   : > { %v926_v19 = vadd.f32 %v1262_v18, %v1063_v9  ;;  %v920_v20 = vpop.f32.mrb[17].mxu1 }
 0x3c2   : > { %v921_v21 = vadd.f32 %v1063_v9, %v920_v20 }
 0x3c3   : > { %944 = vst [vmem:[%s341_s14 + $0x28] sm:$0xff] %v926_v19 }
 0x3c4   : > { %943 = vst [vmem:[%s341_s14 + $0x20] sm:$0xff] %v921_v21  ;;  %v1265_v22 = vpop.f32.mrb[18].mxu1 }
 0x3c5   : > { %v936_v23 = vadd.f32 %v1265_v22, %v1063_v9  ;;  %v930_v24 = vpop.f32.mrb[19].mxu1 }
 0x3c6   : > { %v931_v25 = vadd.f32 %v1063_v9, %v930_v24 }
 0x3c7   : > { %946 = vst [vmem:[%s341_s14 + $0x38] sm:$0xff] %v936_v23 }
 0x3c8   : > { %945 = vst [vmem:[%s341_s14 + $0x30] sm:$0xff] %v931_v25 }
 0x3c9   : > { %1441 = shalt.err (!%p1438_p7)
}
 0x3ca   : > { %s1442_s28 = scalar_lea.hbm %s1778_s22, 1024  ;;  %s1446_s16 = scalar_lea.hbm %s1832_s9, 4096 }
 0x3cb   : > { %p1443_p8 = scmp.ne.s32.totalorder %s1778_s22, %s1442_s28  ;;  %p1447_p1 = scmp.lt.u32.totalorder %s1778_s22, %s1832_s9 }
 0x3cc   : > { %p1448_p0 = scmp.lt.u32.totalorder %s1446_s16, %s1442_s28  ;;  %p1450_p6 = scmp.lt.u32.totalorder %s1442_s28, %s1778_s22 }
 0x3cd   : > { %p1444_p11 = pnand %p1443_p8, %p1843_p9 }
 0x3ce   : > { %p1449_p5 = por %p1448_p0, %p1447_p1 }
 0x3cf   : > { %p1445_p13 = pneg %p1444_p11 }
 0x3d0   : > { %p1451_p10 = por %p1450_p6, %p1449_p5 }
 0x3d2   : > { %p1452_p12 = pnand %p1451_p10, %p1445_p13 }
 0x3d4   : > { %1455 = shalt.err (!%p1452_p12)
}
 0x3d5   : > { %s1500_s25 = smov 128   ;;  %s1501_s26 = smov 8  }
 0x3d6   : > { %1350 = dma.vmem_to_hbm [thread:$0]  (%p1843_p9), %s1773_s24, 1024, %s1778_s22, %s1782_s13, %s1500_s25, %s1500_s25, %s1501_s26  }
 0x3d7 PF: > { %p1362_p2 = scmp.ge.s32.totalorder %s1494_s12, 2  ;;  %s976_s29 = sand.u32 1, %s1482_s30  }
 0x3d8   : > { %p1844_p3 = scmp.ne.s32.totalorder %s1837_s20, 0  ;;  %s977_s23 = scalar_lea.sflag [#allocation4], %s976_s29 }
 0x3da   : > { %p1357_p4 = pnand %p1362_p2, %p1844_p3 }
 0x3dc   : > { %1477 = dma.done.wait (!%p1357_p4), %s977_s23, 1024  }
 0x3dd   : > { %1479 = vsyncadd (!%p1357_p4), %s977_s23, 4294966272  ;;  %p20_p7 = scmp.ge.s32.totalorder %s1577_s15, 6   ;;  %s1845_s30 = smov %s1486_s10 }
 0x3de   : > { %s1846_s10 = smov %s1490_s11  ;;  %s1847_s11 = smov %s1588_s18 }
 0x3df   : > { %s1848_s12 = smov %s1577_s15  ;;  %22 = sbr.rel (!%p20_p7) target bundleno = 4 (0x4), region = 96 }
 0x3e6   :  { %982 = vsyncpa [#allocation3], 1 }
 0x3e7   :  { %984 = vsyncpa [#allocation3 + $0x1], 1 }
 0x3e8   :  { %985 = vsyncpa [#allocation4], 1 }
 0x3e9   :  { %987 = vsyncpa [#allocation4 + $0x1], 1 }

</bundles_post_ra>
